<compile_context>
chip_gen: v5e
topology: v5e:2x2
jax: 0.10.0
libtpu: 0.0.40
codegen_flags: <defaults>
</compile_context>

<pallas_src>
import functools

import jax
import jax.numpy as jnp
from jax.experimental import pallas as pl
from jax.experimental.pallas import tpu as pltpu


def _physical_vmem_bytes():
    """Per-core physical VMEM (128 MiB on v5e/v6e, 64 MiB on v7x)."""
    try:
        info = pltpu.get_tpu_info()
        for attr in ("vmem_capacity_bytes", "vmem_size_bytes", "vmem_bytes"):
            val = getattr(info, attr, None)
            if val:
                return int(val)
    except Exception:
        pass
    return 64 << 20  # conservative (v7x-sized) fallback


def _round_up(x, m):
    return -(-x // m) * m


def _pick_tile_hw(hw, c, itemsize, *, vmem_budget, tile_cap=None):
    """Largest lane-dense pixel tile whose per-step VMEM working set fits.

    Sized by bytes-per-step: double-buffered logits + labels windows plus the
    f32 elementwise temporaries, including sublane padding of small C.
    """
    sub_in = 8 * (4 // itemsize)          # native sublane tile: f32 8, bf16 16
    c_pad_in = _round_up(c, sub_in)       # sublane padding of the input block
    c_pad_f32 = _round_up(c, 8)           # padding of f32 temporaries
    per_px = (
        2 * c_pad_in * itemsize           # double-buffered logits window
        + 2 * 8 * 4                       # double-buffered labels window (1->8 sublanes)
        + 3 * c_pad_f32 * 4               # (C, T) f32 temps (shifted, exp, pick)
        + 6 * 8 * 4                       # (1, T) row temps (8-sublane padded)
    )
    if itemsize < 4:
        per_px += c_pad_f32 * 4           # extra f32 copy from the up-cast
    tile = max(128, (vmem_budget // per_px) // 128 * 128)
    if tile_cap is not None:              # test hook / manual override
        tile = min(tile, max(128, tile_cap // 128 * 128))
    if hw <= tile:
        return hw                         # full-dim block: any size is legal
    return tile                           # multiple of 128; last tile masked


def _ce_kernel(logits_ref, labels_ref, loss_part_ref, cnt_part_ref, *,
               hw_total, ignore_index):
    """One grid step processes a (1, C, tile_hw) slab of logits for batch n.

    logits_ref    : (1, C, tile_hw)   model dtype (f32 / bf16)
    labels_ref    : (1, 1, tile_hw)   int32
    loss_part_ref : (1, 8, 128)       f32, per-batch partial loss sum
    cnt_part_ref  : (1, 8, 128)       f32, per-batch valid-pixel count
    """
    t_id = pl.program_id(1)

    @pl.when(t_id == 0)
    def _init():
        loss_part_ref[...] = jnp.zeros_like(loss_part_ref)
        cnt_part_ref[...] = jnp.zeros_like(cnt_part_ref)

    logits = logits_ref[0].astype(jnp.float32)             # (C, T)
    labels = labels_ref[0]                                  # (1, T) int32
    c_blk, tile_hw = logits.shape

    # Numerically stable log-sum-exp over the class (sublane) axis; the
    # target-class logit is picked via a (C, 1) iota one-hot select on the
    # same shifted operand (lse - picked is invariant to the shift).
    m = jnp.max(logits, axis=0, keepdims=True)              # (1, T)
    shifted = logits - m                                     # (C, T)
    lse_sh = jnp.log(jnp.sum(jnp.exp(shifted), axis=0, keepdims=True))
    class_ids = jax.lax.broadcasted_iota(jnp.int32, (c_blk, 1), 0)  # (C, 1)
    picked_sh = jnp.sum(jnp.where(class_ids == labels, shifted, 0.0),
                        axis=0, keepdims=True)               # (1, T)

    # Valid mask: in-bounds pixels (masks the OOB-padded last tile) and
    # non-ignored labels (PyTorch default ignore_index=-100). Selects only:
    # padded lanes may hold Inf/NaN and must never be mask-multiplied.
    pix = t_id * tile_hw + jax.lax.broadcasted_iota(jnp.int32, (1, tile_hw), 1)
    valid = jnp.logical_and(pix < hw_total, labels != ignore_index)
    loss_vec = jnp.where(valid, lse_sh - picked_sh, 0.0)     # (1, T)
    cnt_vec = jnp.where(valid, 1.0, 0.0)                     # (1, T)

    # Per-tile scalar partial sums accumulated in the per-batch output block
    # (resident in VMEM across the arbitrary tile axis). Final reduce+divide
    # happens in plain JAX so the batch axis can stay "parallel" on v7x.
    tile_loss = jnp.sum(loss_vec, axis=1, keepdims=True)     # (1, 1)
    tile_cnt = jnp.sum(cnt_vec, axis=1, keepdims=True)       # (1, 1)
    loss_part_ref[...] += tile_loss[:, :, None]
    cnt_part_ref[...] += tile_cnt[:, :, None]


def _cross_entropy_single(preds, labels, *, ignore_index=-100, tile_cap=None):
    """Pallas cross-entropy for preds (N, C, H, W) and labels (N, H, W)."""
    if labels.ndim == 4:  # mirrors labels.squeeze(1) in the torch module
        labels = labels[:, 0]
    assert preds.ndim == 4, f"preds must be 4D, got {preds.ndim}"
    assert labels.ndim == 3, f"labels must be 3D, got {labels.ndim}"

    N, C, H, W = preds.shape
    HW = H * W

    # Free reshapes of NCHW memory (no transpose, no extra HBM traffic):
    # classes land on the sublane axis, pixels on the lane axis.
    logits3d = preds.reshape(N, C, HW)
    labels3d = labels.reshape(N, 1, HW).astype(jnp.int32)

    phys_vmem = _physical_vmem_bytes()
    vmem_budget = max(4 << 20, (phys_vmem * 3) // 8)   # per-step working set
    vmem_limit = max(32 << 20, (phys_vmem * 3) // 4)   # scoped-VMEM ceiling

    tile_hw = _pick_tile_hw(HW, C, preds.dtype.itemsize,
                            vmem_budget=vmem_budget, tile_cap=tile_cap)
    n_tiles = pl.cdiv(HW, tile_hw)

    kernel = functools.partial(
        _ce_kernel, hw_total=HW, ignore_index=ignore_index)

    loss_part, cnt_part = pl.pallas_call(
        kernel,
        out_shape=(
            jax.ShapeDtypeStruct((N, 8, 128), jnp.float32),
            jax.ShapeDtypeStruct((N, 8, 128), jnp.float32),
        ),
        grid_spec=pltpu.PrefetchScalarGridSpec(
            num_scalar_prefetch=0,
            grid=(N, n_tiles),
            in_specs=[
                pl.BlockSpec((1, C, tile_hw), lambda n, t: (n, 0, t)),
                pl.BlockSpec((1, 1, tile_hw), lambda n, t: (n, 0, t)),
            ],
            out_specs=[
                pl.BlockSpec((1, 8, 128), lambda n, t: (n, 0, 0)),
                pl.BlockSpec((1, 8, 128), lambda n, t: (n, 0, 0)),
            ],
        ),
        compiler_params=pltpu.CompilerParams(
            # Batch axis parallel (both TensorCores on v7x); the pixel-tile
            # axis is the accumulation axis, hence arbitrary.
            dimension_semantics=("parallel", "arbitrary"),
            vmem_limit_bytes=int(vmem_limit),
        ),
    )(logits3d, labels3d)

    # Every element of a batch's (8, 128) block holds that batch's total;
    # the tiny cross-batch reduction and the mean divide run in plain JAX.
    # All-ignored input gives 0/0 = NaN, matching PyTorch's mean reduction.
    total_loss = jnp.sum(loss_part[:, 0, 0])
    total_cnt = jnp.sum(cnt_part[:, 0, 0])
    return total_loss / total_cnt


def cross_entropy_loss(preds, labels, aux_weights=(0.4, 1.0)):
    """Mirrors CrossEntropyLoss.forward: list-of-preds -> weighted sum."""
    if isinstance(preds, (list, tuple)):
        return sum(
            w * _cross_entropy_single(p, labels)
            for p, w in zip(preds, aux_weights)
        )
    return _cross_entropy_single(preds, labels)


def _reference_ce(preds, labels, ignore_index=-100):
    if labels.ndim == 4:
        labels = labels[:, 0]
    N, C, H, W = preds.shape
    logits = jnp.transpose(preds, (0, 2, 3, 1)).reshape(-1, C)
    logits = logits.astype(jnp.float32)
    lbl = labels.reshape(-1).astype(jnp.int32)
    valid = lbl != ignore_index
    logp = jax.nn.log_softmax(logits, axis=-1)
    safe = jnp.where(valid, lbl, 0)
    nll = -jnp.take_along_axis(logp, safe[:, None], axis=-1)[:, 0]
    return jnp.sum(jnp.where(valid, nll, 0.0)) / jnp.sum(valid)


if __name__ == "__main__":
    key = jax.random.PRNGKey(0)
    k1, k2, k3, k4, k5, k6 = jax.random.split(key, 6)

    # 1) Basic single-pred case (all labels valid, single full-dim tile).
    N, C, H, W = 2, 4, 16, 16
    preds = jax.random.normal(k1, (N, C, H, W), dtype=jnp.float32)
    labels = jax.random.randint(k2, (N, H, W), 0, C, dtype=jnp.int32)
    loss = jax.block_until_ready(cross_entropy_loss(preds, labels))
    ref = _reference_ce(preds, labels)
    assert jnp.allclose(loss, ref, rtol=1e-4, atol=1e-5), (loss, ref)

    # 2) Multi-tile + masked partial last tile + ignore_index path.
    preds2 = jax.random.normal(k3, (1, 4, 17, 15), dtype=jnp.float32)
    labels2 = jax.random.randint(k4, (1, 17, 15), 0, 4, dtype=jnp.int32)
    drop = jax.random.bernoulli(k5, 0.2, labels2.shape)
    labels2 = jnp.where(drop, -100, labels2)
    loss2 = jax.block_until_ready(
        _cross_entropy_single(preds2, labels2, tile_cap=128))
    ref2 = _reference_ce(preds2, labels2)
    assert jnp.allclose(loss2, ref2, rtol=1e-4, atol=1e-5), (loss2, ref2)

    # 3) List-of-preds aux-weight path.
    preds_b = jax.random.normal(k6, (N, C, H, W), dtype=jnp.float32)
    loss3 = jax.block_until_ready(cross_entropy_loss([preds, preds_b], labels))
    ref3 = 0.4 * _reference_ce(preds, labels) + 1.0 * _reference_ce(preds_b, labels)
    assert jnp.allclose(loss3, ref3, rtol=1e-4, atol=1e-5), (loss3, ref3)

    print("KERNEL_OK")
</pallas_src>

<mosaic_0001>
module attributes {stable_mosaic.version = 11 : i64} {
  func.func @_ce_kernel(%arg0: i32, %arg1: i32, %arg2: memref<1x4x256xf32, #tpu.memory_space<vmem>>, %arg3: memref<1x1x256xi32, #tpu.memory_space<vmem>>, %arg4: memref<1x8x128xf32, #tpu.memory_space<vmem>>, %arg5: memref<1x8x128xf32, #tpu.memory_space<vmem>>) attributes {dimension_semantics = [#tpu.dimension_semantics<parallel>, #tpu.dimension_semantics<arbitrary>], iteration_bounds = array<i64: 2, 1>, scalar_prefetch = 0 : i64, scratch_operands = 0 : i64, tpu.core_type = #tpu.core_type<tc>, window_params = [{transform_indices = @transform_0, window_bounds = array<i64: 1, 4, 256>}, {transform_indices = @transform_1, window_bounds = array<i64: 1, 1, 256>}, {transform_indices = @transform_2, window_bounds = array<i64: 1, 8, 128>}, {transform_indices = @transform_3, window_bounds = array<i64: 1, 8, 128>}]} {
    %c0_i32 = arith.constant 0 : i32
    %0 = arith.cmpi eq, %arg1, %c0_i32 : i32
    %1 = arith.extui %0 : i1 to i32
    %c0_i32_0 = arith.constant 0 : i32
    %2 = arith.cmpi ne, %1, %c0_i32_0 : i32
    scf.if %2 {
      %cst_27 = arith.constant 0.000000e+00 : f32
      %52 = vector.broadcast %cst_27 : f32 to vector<1x8x128xf32>
      %c0_28 = arith.constant 0 : index
      %c0_29 = arith.constant 0 : index
      %c0_30 = arith.constant 0 : index
      %53 = vector.load %arg4[%c0_28, %c0_29, %c0_30] : memref<1x8x128xf32, #tpu.memory_space<vmem>>, vector<1x8x128xf32>
      tpu.vector_store %arg4[%c0_28, %c0_29, %c0_30], %52 {strides = array<i32>} : memref<1x8x128xf32, #tpu.memory_space<vmem>>, vector<1x8x128xf32>,
      %cst_31 = arith.constant 0.000000e+00 : f32
      %54 = vector.broadcast %cst_31 : f32 to vector<1x8x128xf32>
      %c0_32 = arith.constant 0 : index
      %c0_33 = arith.constant 0 : index
      %c0_34 = arith.constant 0 : index
      %55 = vector.load %arg5[%c0_32, %c0_33, %c0_34] : memref<1x8x128xf32, #tpu.memory_space<vmem>>, vector<1x8x128xf32>
      tpu.vector_store %arg5[%c0_32, %c0_33, %c0_34], %54 {strides = array<i32>} : memref<1x8x128xf32, #tpu.memory_space<vmem>>, vector<1x8x128xf32>,
    } else {
    }
    %c0 = arith.constant 0 : index
    %c0_1 = arith.constant 0 : index
    %c0_2 = arith.constant 0 : index
    %3 = vector.load %arg2[%c0, %c0_1, %c0_2] : memref<1x4x256xf32, #tpu.memory_space<vmem>>, vector<1x4x256xf32>
    %4 = vector.shape_cast %3 : vector<1x4x256xf32> to vector<4x256xf32>
    %c0_3 = arith.constant 0 : index
    %c0_4 = arith.constant 0 : index
    %c0_5 = arith.constant 0 : index
    %5 = vector.load %arg3[%c0_3, %c0_4, %c0_5] : memref<1x1x256xi32, #tpu.memory_space<vmem>>, vector<1x1x256xi32>
    %6 = vector.shape_cast %5 : vector<1x1x256xi32> to vector<1x256xi32>
    %cst = arith.constant dense<0xFF800000> : vector<256xf32>
    %7 = vector.multi_reduction <maximumf>, %4, %cst [0] : vector<4x256xf32> to vector<256xf32>
    %8 = vector.shape_cast %7 : vector<256xf32> to vector<1x256xf32>
    %9 = vector.broadcast %8 : vector<1x256xf32> to vector<4x256xf32>
    %10 = arith.subf %4, %9 : vector<4x256xf32>
    %11 = math.exp %10 : vector<4x256xf32>
    %cst_6 = arith.constant dense<0.000000e+00> : vector<256xf32>
    %12 = vector.multi_reduction <add>, %11, %cst_6 [0] : vector<4x256xf32> to vector<256xf32>
    %13 = vector.shape_cast %12 : vector<256xf32> to vector<1x256xf32>
    %14 = math.log %13 : vector<1x256xf32>
    %15 = tpu.iota {dimensions = array<i32: 0>} : vector<4x1xi32>
    %16 = vector.broadcast %15 : vector<4x1xi32> to vector<4x256xi32>
    %17 = vector.broadcast %6 : vector<1x256xi32> to vector<4x256xi32>
    %18 = arith.cmpi eq, %16, %17 : vector<4x256xi32>
    %cst_7 = arith.constant 0.000000e+00 : f32
    %19 = vector.broadcast %cst_7 : f32 to vector<4x256xf32>
    %20 = arith.select %18, %10, %19 : vector<4x256xi1>, vector<4x256xf32>
    %cst_8 = arith.constant dense<0.000000e+00> : vector<256xf32>
    %21 = vector.multi_reduction <add>, %20, %cst_8 [0] : vector<4x256xf32> to vector<256xf32>
    %22 = vector.shape_cast %21 : vector<256xf32> to vector<1x256xf32>
    %c256_i32 = arith.constant 256 : i32
    %23 = arith.muli %arg1, %c256_i32 : i32
    %24 = tpu.iota {dimensions = array<i32: 1>} : vector<1x256xi32>
    %25 = vector.broadcast %23 : i32 to vector<1x256xi32>
    %26 = arith.addi %25, %24 : vector<1x256xi32>
    %c256_i32_9 = arith.constant 256 : i32
    %27 = vector.broadcast %c256_i32_9 : i32 to vector<1x256xi32>
    %28 = arith.cmpi slt, %26, %27 : vector<1x256xi32>
    %c-100_i32 = arith.constant -100 : i32
    %29 = vector.broadcast %c-100_i32 : i32 to vector<1x256xi32>
    %30 = arith.cmpi ne, %6, %29 : vector<1x256xi32>
    %31 = arith.andi %28, %30 : vector<1x256xi1>
    %32 = arith.subf %14, %22 : vector<1x256xf32>
    %cst_10 = arith.constant 0.000000e+00 : f32
    %33 = vector.broadcast %cst_10 : f32 to vector<1x256xf32>
    %34 = arith.select %31, %32, %33 : vector<1x256xi1>, vector<1x256xf32>
    %cst_11 = arith.constant 1.000000e+00 : f32
    %cst_12 = arith.constant 0.000000e+00 : f32
    %35 = vector.broadcast %cst_11 : f32 to vector<1x256xf32>
    %36 = vector.broadcast %cst_12 : f32 to vector<1x256xf32>
    %37 = arith.select %31, %35, %36 : vector<1x256xi1>, vector<1x256xf32>
    %cst_13 = arith.constant dense<0.000000e+00> : vector<1xf32>
    %38 = vector.multi_reduction <add>, %34, %cst_13 [1] : vector<1x256xf32> to vector<1xf32>
    %39 = vector.shape_cast %38 : vector<1xf32> to vector<1x1xf32>
    %cst_14 = arith.constant dense<0.000000e+00> : vector<1xf32>
    %40 = vector.multi_reduction <add>, %37, %cst_14 [1] : vector<1x256xf32> to vector<1xf32>
    %41 = vector.shape_cast %40 : vector<1xf32> to vector<1x1xf32>
    %c0_15 = arith.constant 0 : index
    %c0_16 = arith.constant 0 : index
    %c0_17 = arith.constant 0 : index
    %42 = vector.load %arg4[%c0_15, %c0_16, %c0_17] : memref<1x8x128xf32, #tpu.memory_space<vmem>>, vector<1x8x128xf32>
    %43 = vector.shape_cast %39 : vector<1x1xf32> to vector<1x1x1xf32>
    %44 = vector.broadcast %43 : vector<1x1x1xf32> to vector<1x8x128xf32>
    %45 = arith.addf %42, %44 : vector<1x8x128xf32>
    %c0_18 = arith.constant 0 : index
    %c0_19 = arith.constant 0 : index
    %c0_20 = arith.constant 0 : index
    %46 = vector.load %arg4[%c0_18, %c0_19, %c0_20] : memref<1x8x128xf32, #tpu.memory_space<vmem>>, vector<1x8x128xf32>
    tpu.vector_store %arg4[%c0_18, %c0_19, %c0_20], %45 {strides = array<i32>} : memref<1x8x128xf32, #tpu.memory_space<vmem>>, vector<1x8x128xf32>,
    %c0_21 = arith.constant 0 : index
    %c0_22 = arith.constant 0 : index
    %c0_23 = arith.constant 0 : index
    %47 = vector.load %arg5[%c0_21, %c0_22, %c0_23] : memref<1x8x128xf32, #tpu.memory_space<vmem>>, vector<1x8x128xf32>
    %48 = vector.shape_cast %41 : vector<1x1xf32> to vector<1x1x1xf32>
    %49 = vector.broadcast %48 : vector<1x1x1xf32> to vector<1x8x128xf32>
    %50 = arith.addf %47, %49 : vector<1x8x128xf32>
    %c0_24 = arith.constant 0 : index
    %c0_25 = arith.constant 0 : index
    %c0_26 = arith.constant 0 : index
    %51 = vector.load %arg5[%c0_24, %c0_25, %c0_26] : memref<1x8x128xf32, #tpu.memory_space<vmem>>, vector<1x8x128xf32>
    tpu.vector_store %arg5[%c0_24, %c0_25, %c0_26], %50 {strides = array<i32>} : memref<1x8x128xf32, #tpu.memory_space<vmem>>, vector<1x8x128xf32>,
    return
  }
  func.func @transform_0(%arg0: i32, %arg1: i32) -> (i32, i32, i32) {
    %c0_i32 = arith.constant 0 : i32
    %c0_i32_0 = arith.constant 0 : i32
    return %arg0, %c0_i32, %arg1 : i32, i32, i32
  }
  func.func @transform_1(%arg0: i32, %arg1: i32) -> (i32, i32, i32) {
    %c0_i32 = arith.constant 0 : i32
    %c0_i32_0 = arith.constant 0 : i32
    return %arg0, %c0_i32, %arg1 : i32, i32, i32
  }
  func.func @transform_2(%arg0: i32, %arg1: i32) -> (i32, i32, i32) {
    %c0_i32 = arith.constant 0 : i32
    %c0_i32_0 = arith.constant 0 : i32
    %c0_i32_1 = arith.constant 0 : i32
    return %arg0, %c0_i32, %c0_i32_0 : i32, i32, i32
  }
  func.func @transform_3(%arg0: i32, %arg1: i32) -> (i32, i32, i32) {
    %c0_i32 = arith.constant 0 : i32
    %c0_i32_0 = arith.constant 0 : i32
    %c0_i32_1 = arith.constant 0 : i32
    return %arg0, %c0_i32, %c0_i32_0 : i32, i32, i32
  }
}

</mosaic_0001>

<bundles_post_ra>
// kernel: tpu_custom_call.1
= control target key start
LH: loop header
LB: loop body
LE: loop exit
PB: predicated region body
PF: predicated region fallthrough
CT: control target
= control target key end

     0   :  { %9 = vsyncpa [#allocation3], 0  ;;  %s1033_s0 = inlined_call_operand.hbm [shape: f32[2,4,256], index: 0, kind: input, shape index: {}]   ;;  %s1034_s1 = inlined_call_operand.hbm [shape: s32[2,1,256], index: 1, kind: input, shape index: {}]   ;;  %s1035_s2 = inlined_call_operand.hbm [shape: f32[2,8,128], index: 2, kind: output, shape index: {0}]   ;;  %s1036_s3 = inlined_call_operand.hbm [shape: f32[2,8,128], index: 3, kind: output, shape index: {1}]  }
   0x1   :  { %11 = vsyncpa [#allocation3 + $0x1], 0 }
   0x2   :  { %12 = vsyncpa [#allocation6], 0 }
   0x3   :  { %14 = vsyncpa [#allocation6 + $0x1], 0 }
   0x4   :  { %15 = vsyncpa [#allocation4], 0 }
   0x5   :  { %17 = vsyncpa [#allocation4 + $0x1], 0 }
   0x6   :  { %18 = vsyncpa [#allocation9], 0 }
   0x7   :  { %20 = vsyncpa [#allocation9 + $0x1], 0  ;;  %s869_s12 = smov 0   ;;  %s871_s13 = smov 0  }
   0x8   :  { %s873_s14 = smov 0   ;;  %s875_s15 = smov 0  }
   0x9   :  { %s877_s16 = smov 0   ;;  %s879_s17 = smov 0  }
   0xa LB: > { %s566_s18 = sadd.s32 4294967295, %s845_s17   ;;  %s567_s19 = sadd.s32 4294967294, %s845_s17   ;;  %s845_s17 = sphi %s879_s17, %s26_s17   ;;  %s841_s16 = sphi %s877_s16, %s1046_s16   ;;  %s837_s15 = sphi %s875_s15, %s1045_s15   ;;  %s833_s14 = sphi %s873_s14, %s1044_s14   ;;  %s829_s13 = sphi %s871_s13, %s1043_s13   ;;  %s825_s12 = sphi %s869_s12, %s1042_s12  }
   0xb   : > { %s38_s20 = sadd.s32 1, %s841_s16  ;;  %s47_s21 = sadd.s32 1, %s833_s14 }
   0xc   : > { %p40_p0 = scmp.ge.s32.totalorder %s38_s20, 2  ;;  %p54_p1 = scmp.ne.s32.totalorder %s833_s14, %s829_s13 }
   0xd   : > { %p55_p2 = scmp.eq.s32.totalorder %s845_s17, 0  ;;  %p60_p3 = scmp.ne.s32.totalorder %s829_s13, %s825_s12 }
   0xe   : > { %s1048_s20 = smov (%p40_p0, %s38_s20), 0  ;;  %p61_p5 = scmp.eq.s32.totalorder %s566_s18, 0 }
   0xf   : > { %p910_p4 = por %p55_p2, %p54_p1  ;;  %s42_s23 = ssub.s32 %s841_s16, %s1048_s20 }
  0x10   : > { %p112_p6 = scmp.eq.s32.totalorder %s566_s18, 1  ;;  %p45_p7 = scmp.eq.s32.totalorder %s42_s23, 0 }
  0x11   : > { %p916_p8 = por %p61_p5, %p60_p3  ;;  %p118_p10 = scmp.eq.s32.totalorder %s567_s19, 1 }
  0x12   : > { %p920_p9 = por %p112_p6, %p54_p1  ;;  %p569_p12 = scmp.ge.s32.totalorder %s845_s17, 2 }
  0x13   : > { %s925_s26 = scalar_select %p45_p7, %s833_s14, %s47_s21  }
  0x14   : > { %p927_p11 = por %p118_p10, %p60_p3  ;;  %p609_p13 = scmp.lt.s32.totalorder %s845_s17, 2 }
  0x15   : > { %s164_s28 = sand.u32 1, %s833_s14   ;;  %s586_s30 = sshll.u32 %s841_s16, 3 }
  0x16   : > { %s570_s29 = sshll.u32 %s164_s28, 3  ;;  %s175_s6 = scalar_lea.hbm %s1033_s0, %s586_s30 }
  0x17   : > { %s168_s7 = scalar_lea.vmem [#allocation2], %s570_s29  ;;  %s177_s9 = sshll.u32 %s175_s6, 4  ;;  %s178_s9 = int_to_ptr.hbm [resolvable:$true] %s177_s9 }
  0x18   : > { %s179_s8 = sshll.u32 %s168_s7, 4  ;;  %p940_p0 = pnand %p609_p13, %p910_p4  ;;  %s180_s8 = int_to_ptr.vmem [resolvable:$true] %s179_s8 }
  0x19   : > { %p575_p1 = scmp.ge.s32.totalorder %s845_s17, 1  ;;  %p205_p2 = scmp.lt.s32.totalorder %s845_s17, 3 }
  0x1a   : > { %s165_s11 = scalar_lea.sflag [#allocation3], %s164_s28  ;;  %s573_s18 = sshll.u32 %s164_s28, 1 }
  0x1b   : > { %598 = dma.hbm_to_vmem [thread:$0]  (!%p940_p0), %s178_s9, 128, %s180_s8, %s165_s11  }
  0x1c   : > { %p206_p3 = pnand %p575_p1, %p205_p2  ;;  %s574_s19 = sshll.u32 %s841_s16, 1 }
  0x1d   : > { %s196_s29 = scalar_lea.hbm %s1034_s1, %s574_s19  ;;  %s190_s30 = scalar_lea.vmem [#allocation5], %s573_s18 }
  0x1e   : > { %s200_s22 = sshll.u32 %s190_s30, 4  ;;  %s198_s4 = sshll.u32 %s196_s29, 4  ;;  %s201_s22 = int_to_ptr.vmem [resolvable:$true] %s200_s22  ;;  %s199_s4 = int_to_ptr.hbm [resolvable:$true] %s198_s4 }
  0x1f   : > { %s187_s5 = scalar_lea.sflag [#allocation6], %s164_s28  ;;  %209 = sbr.rel (%p206_p3) target bundleno = 248 (0xf8), region = 28 }
  0x20   : > { %601 = dma.hbm_to_vmem [thread:$0]  (!%p940_p0), %s199_s4, 32, %s201_s22, %s187_s5  }
  0x21   : > { %s955_s6 = sand.u32 (!%p206_p3), 1, %s829_s13  }
  0x22   : > { %s958_s7 = sshll.u32 (!%p206_p3), %s955_s6, 3  ;;  %s212_s8 = scalar_lea.sflag (!%p206_p3), [#allocation3], %s955_s6 }
  0x23   : > { %s215_s9 = scalar_lea.vmem (!%p206_p3), [#allocation2], %s958_s7 }
  0x24   : > { %808 = dma.done.wait (%p916_p8), %s212_s8, 128  }
  0x25   : > { %810 = vsyncadd (%p916_p8), %s212_s8, 4294967168  ;;  %s577_s28 = sshll.u32 %s955_s6, 1  ;;  %s222_s10 = scalar_lea.sflag [#allocation6], %s955_s6 }
  0x26   : > { %s225_s11 = scalar_lea.vmem [#allocation5], %s577_s28 }
  0x27   : > { %812 = dma.done.wait (%p916_p8), %s222_s10, 32  }
  0x28   : > { %814 = vsyncadd (%p916_p8), %s222_s10, 4294967264  ;;  %v267_v0 = vld [vmem:[%s215_s9] sm:$0xff]  ;;  %vm275_vm0 = vcmask 1043456   ;;  %v322_v22 = vlaneseq  ;;  %v268_v23 = vld [vmem:[%s225_s11] sm:$0x3]  ;;  %v847_v55 = vmov 0  }
  0x29   : > { %270 = vst [vmem:[#allocation1] ss:$2 sm:$0xff] %v267_v0  ;;  %v324_v31 = vperm.slane %v268_v23, 0  ;;  %v325_v32 = vperm.slane %v268_v23, 1  ;;  %vm359_vm3 = vcmp.ne.s32.totalorder %v268_v23, 4294967196  ;;  %vm373_vm6 = vcmask 1040384  }
  0x2a   : > { %v323_v28 = vshrl.u32 %v322_v22, 7  ;;  %v360_v56 = vsel %vm359_vm3, 1, %v847_v55  ;;  %s582_s24 = sshll.u32 %s837_s15, 3  ;;  %s251_s23 = scalar_lea.vmem [#allocation7], %s958_s7 }
  0x2b   : > { %v361_v59 = vperm.slane %v360_v56, 0  ;;  %v362_v62 = vperm.slane %v360_v56, 1  ;;  %s408_s21 = scalar_lea.hbm %s1035_s2, %s582_s24  ;;  %s410_s29 = sshll.u32 %s251_s23, 4  ;;  %s411_s29 = int_to_ptr.vmem [resolvable:$true] %s410_s29 }
  0x2c   : > { %vm326_vm1 = vcmp.eq.s32.totalorder %v323_v28, %v324_v31  ;;  %vm327_vm2 = vcmp.eq.s32.totalorder %v323_v28, %v325_v32  ;;  %s412_s30 = sshll.u32 %s408_s21, 4  ;;  %s422_s5 = scalar_lea.hbm %s1036_s3, %s582_s24  ;;  %s413_s30 = int_to_ptr.hbm [resolvable:$true] %s412_s30 }
  0x2d   : > { %vm363_vm4 = vcmp.ne.s32.totalorder %v361_v59, 0  ;;  %vm364_vm5 = vcmp.ne.s32.totalorder %v362_v62, 0  ;;  %s393_s8 = scalar_lea.sflag [#allocation4], %s955_s6  ;;  %s741_s9 = sshra.s32 %s413_s30, 4  ;;  %s742_s9 = int_to_ptr.hbm [resolvable:$true] %s741_s9 }
  0x2e   : > { %s743_s15 = scalar_lea.hbm %s742_s9, 8  ;;  %s747_s11 = scalar_lea.hbm %s1035_s2, 16 }
  0x2f   : > { %p744_p4 = scmp.ne.s32.totalorder %s742_s9, %s743_s15  ;;  %p748_p7 = scmp.lt.s32.totalorder %s742_s9, %s1035_s2 }
  0x30   : > { %v271_v1 = vld.sshfl [vmem:[#allocation1] sm:$0xff pattern:$0x75316420]  ;;  %v272_v2 = vld.sshfl [vmem:[#allocation1 + $0x8] sm:$0xff pattern:$0x75316420]  ;;  %p749_p8 = scmp.lt.s32.totalorder %s747_s11, %s743_s15 }
  0x31   : > { %v276_v3 = vsel %vm275_vm0, %v271_v1, -inf  ;;  %v283_v4 = vsel %vm275_vm0, %v272_v2, -inf  ;;  %p745_p5 = pnand %p744_p4, %p920_p9 }
  0x32   : > { %v277_v5 = vrot.slane %v276_v3, 4  ;;  %v284_v6 = vrot.slane %v283_v4, 4  ;;  %p750_p10 = por %p749_p8, %p748_p7 }
  0x33   : > { %p746_p6 = pneg %p745_p5 }
  0x34   : > { %v278_v7 = vmax.f32 %v276_v3, %v277_v5  ;;  %v285_v8 = vmax.f32 %v283_v4, %v284_v6 }
  0x35   : > { %p751_p13 = pnand %p750_p10, %p746_p6 }
  0x36   : > { %v279_v9 = vrot.slane %v278_v7, 2  ;;  %v286_v10 = vrot.slane %v285_v8, 2 }
  0x38   : > { %v280_v11 = vmax.f32 %v278_v7, %v279_v9  ;;  %v287_v12 = vmax.f32 %v285_v8, %v286_v10 }
  0x3a   : > { %v281_v13 = vrot.slane %v280_v11, 1  ;;  %v288_v14 = vrot.slane %v287_v12, 1 }
  0x3c   : > { %v282_v15 = vmax.f32 %v280_v11, %v281_v13  ;;  %v289_v16 = vmax.f32 %v287_v12, %v288_v14  ;;  %v848_v12 = vmov 0.0  }
  0x3d   : > { %v371_v13 = vsel %vm363_vm4, 1.0, %v848_v12  ;;  %v372_v14 = vsel %vm364_vm5, 1.0, %v848_v12 }
  0x3e   : > { %v292_v17 = vrot.slane %v289_v16, 4  ;;  %v380_v16 = vsel %vm373_vm6, %v372_v14, 0.0 }
  0x40   : > { %v293_v18 = vsel %vm275_vm0, %v282_v15, %v292_v17  ;;  %v379_v15 = vsel %vm373_vm6, %v371_v13, 0.0 }
  0x41   : > { %v295_v19 = vsub.f32 %v267_v0, %v293_v18  ;;  %v381_v17 = vadd.f32 %v380_v16, %v379_v15 }
  0x43   : > { %v296_v20 = vmul.f32 1.442695, %v295_v19 }
  0x45   : > { %661 = vpow2.f32 %v296_v20 }
  0x4b   : > { %v662_v21 = vpop.eup %661 }
  0x4c   : > { %299 = vst [vmem:[#allocation1] ss:$2 sm:$0xff] %v662_v21 }
  0x53   : > { %v300_v24 = vld.sshfl [vmem:[#allocation1] sm:$0xff pattern:$0x75316420]  ;;  %v301_v25 = vld.sshfl [vmem:[#allocation1 + $0x8] sm:$0xff pattern:$0x75316420] }
  0x54   : > { %v304_v26 = vsel %vm275_vm0, %v300_v24, 0.0  ;;  %v311_v27 = vsel %vm275_vm0, %v301_v25, 0.0  ;;  %329 = vst [vmem:[#allocation1] ss:$2 sm:$0xff] %v295_v19 }
  0x55   : > { %v305_v29 = vrot.slane %v304_v26, 4  ;;  %v312_v30 = vrot.slane %v311_v27, 4 }
  0x57   : > { %v306_v33 = vadd.f32 %v305_v29, %v304_v26  ;;  %v313_v34 = vadd.f32 %v312_v30, %v311_v27 }
  0x59   : > { %v307_v35 = vrot.slane %v306_v33, 2  ;;  %v314_v36 = vrot.slane %v313_v34, 2 }
  0x5b   : > { %v308_v37 = vadd.f32 %v307_v35, %v306_v33  ;;  %v315_v38 = vadd.f32 %v314_v36, %v313_v34  ;;  %v330_v39 = vld.sshfl [vmem:[#allocation1] sm:$0xff pattern:$0x75316420]  ;;  %v331_v40 = vld.sshfl [vmem:[#allocation1 + $0x8] sm:$0xff pattern:$0x75316420] }
  0x5c   : > { %v334_v41 = vsel %vm326_vm1, %v330_v39, 0.0  ;;  %v335_v42 = vsel %vm327_vm2, %v331_v40, 0.0 }
  0x5d   : > { %v309_v43 = vrot.slane %v308_v37, 1  ;;  %v316_v44 = vrot.slane %v315_v38, 1  ;;  %v336_v45 = vsel %vm275_vm0, %v334_v41, 0.0  ;;  %v343_v46 = vsel %vm275_vm0, %v335_v42, 0.0 }
  0x5e   : > { %v337_v47 = vrot.slane %v336_v45, 4  ;;  %v344_v48 = vrot.slane %v343_v46, 4 }
  0x5f   : > { %v310_v49 = vadd.f32 %v309_v43, %v308_v37  ;;  %v317_v50 = vadd.f32 %v316_v44, %v315_v38 }
  0x60   : > { %v338_v51 = vadd.f32 %v337_v47, %v336_v45  ;;  %v345_v52 = vadd.f32 %v344_v48, %v343_v46 }
  0x61   : > { %663 = vlog2.f32 %v310_v49 }
  0x62   : > { %665 = vlog2.f32 %v317_v50  ;;  %v339_v53 = vrot.slane %v338_v51, 2  ;;  %v346_v54 = vrot.slane %v345_v52, 2 }
  0x64   : > { %v340_v57 = vadd.f32 %v339_v53, %v338_v51  ;;  %v347_v58 = vadd.f32 %v346_v54, %v345_v52 }
  0x66   : > { %v341_v60 = vrot.slane %v340_v57, 1  ;;  %v348_v61 = vrot.slane %v347_v58, 1 }
  0x67   : > { %v664_v63 = vpop.eup %663 }
  0x68   : > { %v666_v0 = vpop.eup %665  ;;  %v319_v1 = vmul.f32 0.6931472, %v664_v63  ;;  %v342_v2 = vadd.f32 %v341_v60, %v340_v57  ;;  %v349_v3 = vadd.f32 %v348_v61, %v347_v58 }
  0x69   : > { %v321_v4 = vmul.f32 0.6931472, %v666_v0 }
  0x6a   : > { %v367_v5 = vsub.f32 %v319_v1, %v342_v2 }
  0x6b   : > { %v368_v6 = vsub.f32 %v321_v4, %v349_v3 }
  0x6c   : > { %v369_v7 = vsel %vm363_vm4, %v367_v5, 0.0 }
  0x6d   : > { %v370_v8 = vsel %vm364_vm5, %v368_v6, 0.0  ;;  %v374_v9 = vsel %vm373_vm6, %v369_v7, 0.0 }
  0x6e   : > { %v375_v10 = vsel %vm373_vm6, %v370_v8, 0.0 }
  0x6f   : > { %v376_v11 = vadd.f32 %v375_v10, %v374_v9 }
  0x71   : > { %377 = vadd.xlane.f32.xlu0 %v376_v11 }
  0x79   : > { %382 = vadd.xlane.f32.xlu0 %v381_v17 }
  0xe4   : > { %v378_v18 = vpop.xlane.xlu0 %377 }
  0xe5   : > { %v385_v19 = vperm.slane %v378_v18, 0 }
  0xe7   : > { %387 = vst [vmem:[%s251_s23] sm:$0xff] %v385_v19 }
  0xe8   : > { %754 = shalt.err (!%p751_p13)
}
  0xe9   : > { %591 = dma.vmem_to_hbm [thread:$0]  (%p920_p9), %s411_s29, 128, %s413_s30, %s393_s8  }
  0xea   : > { %s258_s24 = scalar_lea.vmem [#allocation8], %s958_s7  ;;  %s426_s23 = sshll.u32 %s422_s5, 4  ;;  %s427_s23 = int_to_ptr.hbm [resolvable:$true] %s426_s23 }
  0xeb   : > { %s424_s21 = sshll.u32 %s258_s24, 4  ;;  %s398_s22 = scalar_lea.sflag [#allocation9], %s955_s6  ;;  %s425_s21 = int_to_ptr.vmem [resolvable:$true] %s424_s21 }
  0xec   : > { %v383_v20 = vpop.xlane.xlu0 %382  ;;  %s769_s4 = sshra.s32 %s427_s23, 4  ;;  %s775_s29 = scalar_lea.hbm %s1036_s3, 16  ;;  %s770_s4 = int_to_ptr.hbm [resolvable:$true] %s769_s4 }
  0xed   : > { %v389_v21 = vperm.slane %v383_v20, 0  ;;  %s771_s9 = scalar_lea.hbm %s770_s4, 8  ;;  %p776_p3 = scmp.lt.s32.totalorder %s770_s4, %s1036_s3 }
  0xee   : > { %p772_p0 = scmp.ne.s32.totalorder %s770_s4, %s771_s9  ;;  %p777_p4 = scmp.lt.s32.totalorder %s775_s29, %s771_s9 }
  0xef   : > { %391 = vst [vmem:[%s258_s24] sm:$0xff] %v389_v21 }
  0xf0   : > { %p773_p1 = pnand %p772_p0, %p920_p9  ;;  %p778_p5 = por %p777_p4, %p776_p3 }
  0xf2   : > { %p774_p2 = pneg %p773_p1 }
  0xf4   : > { %p779_p6 = pnand %p778_p5, %p774_p2 }
  0xf6   : > { %782 = shalt.err (!%p779_p6)
}
  0xf7   : > { %592 = dma.vmem_to_hbm [thread:$0]  (%p920_p9), %s425_s21, 128, %s427_s23, %s398_s22  }
  0xf8 PF: > { %s438_s6 = sand.u32 1, %s825_s12   ;;  %p603_p7 = pnand %p569_p12, %p927_p11 }
  0xf9   : > { %s439_s5 = scalar_lea.sflag [#allocation4], %s438_s6 }
  0xfa   : > { %p604_p8 = pneg %p603_p7 }
  0xfc   : > { %816 = dma.done.wait (%p604_p8), %s439_s5, 128  }
  0xfd   : > { %818 = vsyncadd (%p604_p8), %s439_s5, 4294967168  ;;  %s449_s8 = scalar_lea.sflag [#allocation9], %s438_s6 }
  0xfe   : > { %820 = dma.done.wait (%p604_p8), %s449_s8, 128  }
  0xff   : > { %822 = vsyncadd (%p604_p8), %s449_s8, 4294967168  ;;  %s26_s17 = sadd.s32 1, %s845_s17   ;;  %s1042_s12 = smov %s829_s13 }
 0x100   : > { %p23_p10 = scmp.ge.s32.totalorder %s26_s17, 4   ;;  %s1043_s13 = smov %s833_s14 }
 0x101   : > { %s1044_s14 = smov %s925_s26  ;;  %s1045_s15 = smov %s841_s16 }
 0x102   : > { %s1046_s16 = smov %s1048_s20  ;;  %25 = sbr.rel (!%p23_p10) target bundleno = 10 (0xa), region = 107 }
 0x107   :  { %455 = vsyncpa [#allocation3], 1 }
 0x108   :  { %457 = vsyncpa [#allocation3 + $0x1], 1 }
 0x109   :  { %458 = vsyncpa [#allocation6], 1 }
 0x10a   :  { %460 = vsyncpa [#allocation6 + $0x1], 1 }
 0x10b   :  { %461 = vsyncpa [#allocation4], 1 }
 0x10c   :  { %463 = vsyncpa [#allocation4 + $0x1], 1 }
 0x10d   :  { %464 = vsyncpa [#allocation9], 1 }
 0x10e   :  { %466 = vsyncpa [#allocation9 + $0x1], 1 }

</bundles_post_ra>
